<compile_context>
chip_gen: v6e
topology: v6e:2x2x1
jax: 0.10.0
libtpu: 0.0.40
codegen_flags: <defaults>
</compile_context>

<pallas_src>
import math

import jax
import jax.numpy as jnp
from jax.experimental import pallas as pl
from jax.experimental.pallas import tpu as pltpu


def _round_up(x, m):
    return ((x + m - 1) // m) * m


# ----------------------------------------------------------------------------
# Kernels: default (gather) path
# ----------------------------------------------------------------------------
def _gather_vmem_kernel(ids_ref, lut_ref, out_ref):
    """Small-table fast path: lut fully resident in VMEM; gather T rows per step."""
    i = pl.program_id(0)
    T, D = out_ref.shape
    base = i * T
    rows = [lut_ref[pl.ds(ids_ref[base + j], 1), :] for j in range(T)]  # T x (1, D)
    gathered = jnp.concatenate(rows, axis=0)                            # (T, D) dense
    out_ref[...] = (gathered * math.sqrt(D)).astype(out_ref.dtype)


def _gather_dma_kernel(ids_ref, lut_hbm, out_ref, buf_ref, sem_ref):
    """Large-table path: T in-flight HBM row DMAs per step, double-buffered across
    grid steps (slot = step & 1).  Requires in-order ("arbitrary") grid execution."""
    i = pl.program_id(0)
    n_steps = pl.num_programs(0)
    T, D = out_ref.shape

    def start_step(step, slot):
        # Issue all T row copies before any wait so they overlap each other.
        for j in range(T):
            pltpu.make_async_copy(
                lut_hbm.at[ids_ref[step * T + j]],
                buf_ref.at[slot, j],
                sem_ref.at[slot, j],
            ).start()

    @pl.when(i == 0)
    def _():
        start_step(0, 0)                       # prime slot 0

    @pl.when(i + 1 < n_steps)
    def _():
        start_step(i + 1, (i + 1) % 2)         # prefetch next step into the other slot

    slot = i % 2
    for j in range(T):
        pltpu.make_async_copy(
            lut_hbm.at[0], buf_ref.at[slot, j], sem_ref.at[slot, j]
        ).wait()

    # One dense (T, D) scaled store per step (unmasked, full-vreg work).
    out_ref[...] = (buf_ref[slot] * math.sqrt(D)).astype(out_ref.dtype)


# ----------------------------------------------------------------------------
# Kernel: cycle_trace path (online softmax @ lut, accumulate in out_ref)
# ----------------------------------------------------------------------------
def _soft_embed_kernel(x_ref, g_ref, lut_ref, out_ref, m_ref, l_ref):
    v_idx = pl.program_id(1)

    @pl.when(v_idx == 0)
    def _():
        m_ref[...] = jnp.full_like(m_ref, -jnp.inf)
        l_ref[...] = jnp.zeros_like(l_ref)
        out_ref[...] = jnp.zeros_like(out_ref)   # out_ref (f32) is the accumulator

    # Online softmax over the vocab axis (tv-wide tiles).
    s = jnp.log(x_ref[...]) - g_ref[...]                          # (tn, tv)
    m_prev = m_ref[...]
    m_new = jnp.maximum(m_prev, jnp.max(s, axis=-1, keepdims=True))
    alpha = jnp.exp(m_prev - m_new)
    p = jnp.exp(s - m_new)                                        # un-normalized probs
    l_ref[...] = alpha * l_ref[...] + jnp.sum(p, axis=-1, keepdims=True)
    # Cast p to the lut dtype: pass a bf16 lut on v6e/v7x for native MXU throughput
    # and half the HBM stream; accumulation stays f32.
    out_ref[...] = alpha * out_ref[...] + jnp.dot(
        p.astype(lut_ref.dtype), lut_ref[...], preferred_element_type=jnp.float32
    )
    m_ref[...] = m_new

    @pl.when(v_idx == pl.num_programs(1) - 1)
    def _():
        d = out_ref.shape[-1]
        # Exact divide (once per output tile, essentially free) for tight parity.
        out_ref[...] = out_ref[...] * (math.sqrt(d) / l_ref[...])


# ----------------------------------------------------------------------------
# Wrappers
# ----------------------------------------------------------------------------
def embeddings_forward(ids, lut, *, tokens_per_step=16,
                       vmem_table_limit_bytes=8 * 1024 * 1024, force_dma=False):
    """Default path: lut(ids) * sqrt(d_model).  ids: (B, S) int, lut: (V, D)."""
    B, S = ids.shape
    V, D = lut.shape
    assert D % 128 == 0, "keep output tiles lane-dense (D must be a multiple of 128)"

    N = B * S
    T = max(8, min(int(tokens_per_step), 256))     # >=8 -> sublane-dense output blocks
    N_pad = _round_up(N, T)
    num_steps = N_pad // T

    ids_flat = jnp.clip(ids.reshape(N).astype(jnp.int32), 0, V - 1)  # guard OOB DMAs
    if N_pad != N:
        ids_flat = jnp.concatenate(
            [ids_flat, jnp.zeros((N_pad - N,), jnp.int32)], axis=0)

    table_bytes = V * D * jnp.dtype(lut.dtype).itemsize
    use_vmem_table = (not force_dma) and table_bytes <= vmem_table_limit_bytes

    if use_vmem_table:
        out = pl.pallas_call(
            _gather_vmem_kernel,
            out_shape=jax.ShapeDtypeStruct((N_pad, D), lut.dtype),
            grid_spec=pltpu.PrefetchScalarGridSpec(
                num_scalar_prefetch=1,               # ids -> SMEM
                grid=(num_steps,),
                in_specs=[
                    # Full table, constant block index -> resident in VMEM, fetched once.
                    pl.BlockSpec((V, D), lambda i, ids: (0, 0)),
                ],
                out_specs=pl.BlockSpec((T, D), lambda i, ids: (i, 0)),
            ),
            compiler_params=pltpu.CompilerParams(
                dimension_semantics=("parallel",),   # steps independent -> megacore OK
                vmem_limit_bytes=32 * 1024 * 1024,
            ),
        )(ids_flat, lut)
    else:
        out = pl.pallas_call(
            _gather_dma_kernel,
            out_shape=jax.ShapeDtypeStruct((N_pad, D), lut.dtype),
            grid_spec=pltpu.PrefetchScalarGridSpec(
                num_scalar_prefetch=1,               # ids -> SMEM (drives the row DMAs)
                grid=(num_steps,),
                in_specs=[pl.BlockSpec(memory_space=pl.ANY)],   # lut stays in HBM
                out_specs=pl.BlockSpec((T, D), lambda i, ids: (i, 0)),
                scratch_shapes=[
                    pltpu.VMEM((2, T, D), lut.dtype),           # double-buffered rows
                    pltpu.SemaphoreType.DMA((2, T)),
                ],
            ),
            compiler_params=pltpu.CompilerParams(
                # Cross-step double-buffer needs in-order execution of this axis.
                dimension_semantics=("arbitrary",),
                vmem_limit_bytes=32 * 1024 * 1024,
            ),
        )(ids_flat, lut)

    return out[:N].reshape(B, S, D)


def embeddings_forward_cycle_trace(x, lut, key, *, tn=256, tv=512):
    """cycle_trace path: softmax(log(x) - log(-log(u))) @ lut * sqrt(d_model)."""
    B, S, V = x.shape
    V2, D = lut.shape
    assert V == V2
    assert V % 128 == 0 and D % 128 == 0
    lut_itemsize = jnp.dtype(lut.dtype).itemsize

    N = B * S
    # Token tile: as large as possible (MXU M-dim fill, lut re-streamed N/tn times).
    n_pad8 = _round_up(N, 8)
    tn_eff = min(_round_up(tn, 8), n_pad8)
    N_pad = _round_up(N, tn_eff)

    # Vocab tile: multiple of 128 that divides V and keeps the double-buffered lut
    # tile <= 16 MiB (fits v7x's 64-MiB VMEM with headroom; bigger on v5e/v6e is fine).
    tv_eff = min(_round_up(tv, 128), V)
    while tv_eff > 128 and (
        V % tv_eff != 0 or 2 * tv_eff * D * lut_itemsize > 16 * 1024 * 1024
    ):
        tv_eff -= 128
    assert V % tv_eff == 0

    # Single shared noise row of length V, as in the PyTorch code (torch.rand([V])).
    u = jax.random.uniform(key, (V,), dtype=jnp.float32)
    u = jnp.maximum(u, jnp.finfo(jnp.float32).tiny)     # avoid log(0) at the u=0 tail
    g = jnp.log(-jnp.log(u)).reshape(1, V)

    x2 = x.reshape(N, V).astype(jnp.float32)
    if N_pad != N:
        # Pad with ones: log(1)=0 keeps padded rows finite; they are sliced off below.
        x2 = jnp.concatenate([x2, jnp.ones((N_pad - N, V), jnp.float32)], axis=0)

    # VMEM budget estimate (double-buffered inputs + resident f32 out tile + scratch),
    # capped at 48 MiB so it is safe on v7x (64 MiB physical per TensorCore).
    est = (2 * tn_eff * tv_eff * 4 + 2 * tv_eff * 4
           + 2 * tv_eff * D * lut_itemsize + 2 * tn_eff * D * 4 + 4 * tn_eff * 4)
    vmem_limit = int(min(48 * 1024 * 1024, max(32 * 1024 * 1024, est * 5 // 4)))

    out = pl.pallas_call(
        _soft_embed_kernel,
        out_shape=jax.ShapeDtypeStruct((N_pad, D), jnp.float32),
        grid_spec=pltpu.PrefetchScalarGridSpec(
            num_scalar_prefetch=0,
            grid=(N_pad // tn_eff, V // tv_eff),         # vocab = innermost reduction
            in_specs=[
                pl.BlockSpec((tn_eff, tv_eff), lambda n, v: (n, v)),   # x tile
                pl.BlockSpec((1, tv_eff), lambda n, v: (0, v)),        # gumbel noise
                # TODO(synk): add pipeline_mode=pl.Buffered(3) here if profiling shows
                # exposed lut DMA for small D after enlarging tn/tv.
                pl.BlockSpec((tv_eff, D), lambda n, v: (v, 0)),        # lut tile
            ],
            out_specs=pl.BlockSpec((tn_eff, D), lambda n, v: (n, 0)),  # resident acc
            scratch_shapes=[
                pltpu.VMEM((tn_eff, 1), jnp.float32),   # running max
                pltpu.VMEM((tn_eff, 1), jnp.float32),   # running softmax denominator
            ],
        ),
        compiler_params=pltpu.CompilerParams(
            dimension_semantics=("parallel", "arbitrary"),
            vmem_limit_bytes=vmem_limit,
        ),
    )(x2, g, lut)
    return out[:N].reshape(B, S, D), g


# ----------------------------------------------------------------------------
# Main
# ----------------------------------------------------------------------------
if __name__ == "__main__":
    B, S = 2, 8
    vocab, d_model = 256, 128

    key = jax.random.PRNGKey(0)
    k_lut, k_ids, k_x, k_gumbel = jax.random.split(key, 4)

    # Deterministic "nn.Embedding" weight (synthetic).
    lut = jax.random.normal(k_lut, (vocab, d_model), dtype=jnp.float32)

    # ---- Default path: integer token ids -> scaled embedding gather ----
    ids = jax.random.randint(k_ids, (B, S), 0, vocab, dtype=jnp.int32)
    ref = jnp.take(lut, ids, axis=0) * math.sqrt(d_model)

    # (a) VMEM-resident fast path (table is only 128 KiB here).
    out_v = jax.block_until_ready(embeddings_forward(ids, lut))
    assert out_v.shape == (B, S, d_model)
    assert jnp.allclose(out_v, ref, atol=1e-5, rtol=1e-5)

    # (b) Batched manual-DMA gather path (forced; T=8 -> 2 grid steps, exercises the
    #     cross-step double buffer: prime slot 0, prefetch slot 1, wait, store).
    out_d = jax.block_until_ready(
        embeddings_forward(ids, lut, tokens_per_step=8, force_dma=True))
    assert jnp.allclose(out_d, ref, atol=1e-5, rtol=1e-5)

    # ---- cycle_trace path: soft distribution over vocab -> gumbel-softmax mix ----
    x_logits = jax.random.normal(k_x, (B, S, vocab), dtype=jnp.float32)
    x_probs = jax.nn.softmax(x_logits, axis=-1)

    # (c) f32 lut, default (large) tiles -> single-pass softmax, exact MXU accumulate.
    out_ct, g = embeddings_forward_cycle_trace(x_probs, lut, k_gumbel)
    out_ct = jax.block_until_ready(out_ct)
    p_ref = jax.nn.softmax(jnp.log(x_probs) - g.reshape(1, 1, vocab), axis=-1)
    ref_ct = jnp.einsum("bsv,vd->bsd", p_ref, lut) * math.sqrt(d_model)
    assert out_ct.shape == (B, S, d_model)
    assert jnp.allclose(out_ct, ref_ct, atol=1e-3, rtol=1e-3)

    # (d) f32 lut, small tiles -> exercises the multi-step online-softmax reduction
    #     and multiple token tiles on the "parallel" axis.
    out_ct2, _ = embeddings_forward_cycle_trace(x_probs, lut, k_gumbel, tn=8, tv=128)
    out_ct2 = jax.block_until_ready(out_ct2)
    assert jnp.allclose(out_ct2, ref_ct, atol=1e-3, rtol=1e-3)

    # (e) bf16 lut (v6e/v7x MXU-native path; f32 accumulation preserved).
    out_bf, _ = embeddings_forward_cycle_trace(
        x_probs, lut.astype(jnp.bfloat16), k_gumbel, tn=8, tv=128)
    out_bf = jax.block_until_ready(out_bf)
    assert jnp.allclose(out_bf, ref_ct, atol=5e-2, rtol=5e-2)

    print("KERNEL_OK")
</pallas_src>

<mosaic_0001>
module attributes {stable_mosaic.version = 11 : i64} {
  func.func @_gather_vmem_kernel(%arg0: i32, %arg1: memref<16xi32, #tpu.memory_space<smem>>, %arg2: memref<256x128xf32, #tpu.memory_space<vmem>>, %arg3: memref<16x128xf32, #tpu.memory_space<vmem>>) attributes {dimension_semantics = [#tpu.dimension_semantics<parallel>], iteration_bounds = array<i64: 1>, scalar_prefetch = 1 : i64, scratch_operands = 0 : i64, tpu.core_type = #tpu.core_type<tc>, window_params = [{pipeline_mode = #tpu.pipeline_mode<synchronous>, transform_indices = @transform_0, window_bounds = array<i64: 256, 128>}, {transform_indices = @transform_1, window_bounds = array<i64: 16, 128>}]} {
    %c16_i32 = arith.constant 16 : i32
    %0 = arith.muli %arg0, %c16_i32 : i32
    %c0_i32 = arith.constant 0 : i32
    %1 = arith.addi %0, %c0_i32 : i32
    %2 = arith.index_cast %1 : i32 to index
    %3 = memref.load %arg1[%2] : memref<16xi32, #tpu.memory_space<smem>>
    %4 = arith.index_cast %3 : i32 to index
    %c0 = arith.constant 0 : index
    %5 = vector.load %arg2[%4, %c0] : memref<256x128xf32, #tpu.memory_space<vmem>>, vector<1x128xf32>
    %c1_i32 = arith.constant 1 : i32
    %6 = arith.addi %0, %c1_i32 : i32
    %7 = arith.index_cast %6 : i32 to index
    %8 = memref.load %arg1[%7] : memref<16xi32, #tpu.memory_space<smem>>
    %9 = arith.index_cast %8 : i32 to index
    %c0_0 = arith.constant 0 : index
    %10 = vector.load %arg2[%9, %c0_0] : memref<256x128xf32, #tpu.memory_space<vmem>>, vector<1x128xf32>
    %c2_i32 = arith.constant 2 : i32
    %11 = arith.addi %0, %c2_i32 : i32
    %12 = arith.index_cast %11 : i32 to index
    %13 = memref.load %arg1[%12] : memref<16xi32, #tpu.memory_space<smem>>
    %14 = arith.index_cast %13 : i32 to index
    %c0_1 = arith.constant 0 : index
    %15 = vector.load %arg2[%14, %c0_1] : memref<256x128xf32, #tpu.memory_space<vmem>>, vector<1x128xf32>
    %c3_i32 = arith.constant 3 : i32
    %16 = arith.addi %0, %c3_i32 : i32
    %17 = arith.index_cast %16 : i32 to index
    %18 = memref.load %arg1[%17] : memref<16xi32, #tpu.memory_space<smem>>
    %19 = arith.index_cast %18 : i32 to index
    %c0_2 = arith.constant 0 : index
    %20 = vector.load %arg2[%19, %c0_2] : memref<256x128xf32, #tpu.memory_space<vmem>>, vector<1x128xf32>
    %c4_i32 = arith.constant 4 : i32
    %21 = arith.addi %0, %c4_i32 : i32
    %22 = arith.index_cast %21 : i32 to index
    %23 = memref.load %arg1[%22] : memref<16xi32, #tpu.memory_space<smem>>
    %24 = arith.index_cast %23 : i32 to index
    %c0_3 = arith.constant 0 : index
    %25 = vector.load %arg2[%24, %c0_3] : memref<256x128xf32, #tpu.memory_space<vmem>>, vector<1x128xf32>
    %c5_i32 = arith.constant 5 : i32
    %26 = arith.addi %0, %c5_i32 : i32
    %27 = arith.index_cast %26 : i32 to index
    %28 = memref.load %arg1[%27] : memref<16xi32, #tpu.memory_space<smem>>
    %29 = arith.index_cast %28 : i32 to index
    %c0_4 = arith.constant 0 : index
    %30 = vector.load %arg2[%29, %c0_4] : memref<256x128xf32, #tpu.memory_space<vmem>>, vector<1x128xf32>
    %c6_i32 = arith.constant 6 : i32
    %31 = arith.addi %0, %c6_i32 : i32
    %32 = arith.index_cast %31 : i32 to index
    %33 = memref.load %arg1[%32] : memref<16xi32, #tpu.memory_space<smem>>
    %34 = arith.index_cast %33 : i32 to index
    %c0_5 = arith.constant 0 : index
    %35 = vector.load %arg2[%34, %c0_5] : memref<256x128xf32, #tpu.memory_space<vmem>>, vector<1x128xf32>
    %c7_i32 = arith.constant 7 : i32
    %36 = arith.addi %0, %c7_i32 : i32
    %37 = arith.index_cast %36 : i32 to index
    %38 = memref.load %arg1[%37] : memref<16xi32, #tpu.memory_space<smem>>
    %39 = arith.index_cast %38 : i32 to index
    %c0_6 = arith.constant 0 : index
    %40 = vector.load %arg2[%39, %c0_6] : memref<256x128xf32, #tpu.memory_space<vmem>>, vector<1x128xf32>
    %c8_i32 = arith.constant 8 : i32
    %41 = arith.addi %0, %c8_i32 : i32
    %42 = arith.index_cast %41 : i32 to index
    %43 = memref.load %arg1[%42] : memref<16xi32, #tpu.memory_space<smem>>
    %44 = arith.index_cast %43 : i32 to index
    %c0_7 = arith.constant 0 : index
    %45 = vector.load %arg2[%44, %c0_7] : memref<256x128xf32, #tpu.memory_space<vmem>>, vector<1x128xf32>
    %c9_i32 = arith.constant 9 : i32
    %46 = arith.addi %0, %c9_i32 : i32
    %47 = arith.index_cast %46 : i32 to index
    %48 = memref.load %arg1[%47] : memref<16xi32, #tpu.memory_space<smem>>
    %49 = arith.index_cast %48 : i32 to index
    %c0_8 = arith.constant 0 : index
    %50 = vector.load %arg2[%49, %c0_8] : memref<256x128xf32, #tpu.memory_space<vmem>>, vector<1x128xf32>
    %c10_i32 = arith.constant 10 : i32
    %51 = arith.addi %0, %c10_i32 : i32
    %52 = arith.index_cast %51 : i32 to index
    %53 = memref.load %arg1[%52] : memref<16xi32, #tpu.memory_space<smem>>
    %54 = arith.index_cast %53 : i32 to index
    %c0_9 = arith.constant 0 : index
    %55 = vector.load %arg2[%54, %c0_9] : memref<256x128xf32, #tpu.memory_space<vmem>>, vector<1x128xf32>
    %c11_i32 = arith.constant 11 : i32
    %56 = arith.addi %0, %c11_i32 : i32
    %57 = arith.index_cast %56 : i32 to index
    %58 = memref.load %arg1[%57] : memref<16xi32, #tpu.memory_space<smem>>
    %59 = arith.index_cast %58 : i32 to index
    %c0_10 = arith.constant 0 : index
    %60 = vector.load %arg2[%59, %c0_10] : memref<256x128xf32, #tpu.memory_space<vmem>>, vector<1x128xf32>
    %c12_i32 = arith.constant 12 : i32
    %61 = arith.addi %0, %c12_i32 : i32
    %62 = arith.index_cast %61 : i32 to index
    %63 = memref.load %arg1[%62] : memref<16xi32, #tpu.memory_space<smem>>
    %64 = arith.index_cast %63 : i32 to index
    %c0_11 = arith.constant 0 : index
    %65 = vector.load %arg2[%64, %c0_11] : memref<256x128xf32, #tpu.memory_space<vmem>>, vector<1x128xf32>
    %c13_i32 = arith.constant 13 : i32
    %66 = arith.addi %0, %c13_i32 : i32
    %67 = arith.index_cast %66 : i32 to index
    %68 = memref.load %arg1[%67] : memref<16xi32, #tpu.memory_space<smem>>
    %69 = arith.index_cast %68 : i32 to index
    %c0_12 = arith.constant 0 : index
    %70 = vector.load %arg2[%69, %c0_12] : memref<256x128xf32, #tpu.memory_space<vmem>>, vector<1x128xf32>
    %c14_i32 = arith.constant 14 : i32
    %71 = arith.addi %0, %c14_i32 : i32
    %72 = arith.index_cast %71 : i32 to index
    %73 = memref.load %arg1[%72] : memref<16xi32, #tpu.memory_space<smem>>
    %74 = arith.index_cast %73 : i32 to index
    %c0_13 = arith.constant 0 : index
    %75 = vector.load %arg2[%74, %c0_13] : memref<256x128xf32, #tpu.memory_space<vmem>>, vector<1x128xf32>
    %c15_i32 = arith.constant 15 : i32
    %76 = arith.addi %0, %c15_i32 : i32
    %77 = arith.index_cast %76 : i32 to index
    %78 = memref.load %arg1[%77] : memref<16xi32, #tpu.memory_space<smem>>
    %79 = arith.index_cast %78 : i32 to index
    %c0_14 = arith.constant 0 : index
    %80 = vector.load %arg2[%79, %c0_14] : memref<256x128xf32, #tpu.memory_space<vmem>>, vector<1x128xf32>
    %81 = tpu.concatenate %5, %10, %15, %20, %25, %30, %35, %40, %45, %50, %55, %60, %65, %70, %75, %80 in 0 : vector<1x128xf32>, vector<1x128xf32>, vector<1x128xf32>, vector<1x128xf32>, vector<1x128xf32>, vector<1x128xf32>, vector<1x128xf32>, vector<1x128xf32>, vector<1x128xf32>, vector<1x128xf32>, vector<1x128xf32>, vector<1x128xf32>, vector<1x128xf32>, vector<1x128xf32>, vector<1x128xf32>, vector<1x128xf32> -> vector<16x128xf32>
    %cst = arith.constant 11.3137083 : f32
    %82 = vector.broadcast %cst : f32 to vector<16x128xf32>
    %83 = arith.mulf %81, %82 : vector<16x128xf32>
    %c0_15 = arith.constant 0 : index
    %c0_16 = arith.constant 0 : index
    %84 = vector.load %arg3[%c0_15, %c0_16] : memref<16x128xf32, #tpu.memory_space<vmem>>, vector<16x128xf32>
    tpu.vector_store %arg3[%c0_15, %c0_16], %83 {strides = array<i32>} : memref<16x128xf32, #tpu.memory_space<vmem>>, vector<16x128xf32>,
    return
  }
  func.func @transform_0(%arg0: i32, %arg1: memref<16xi32, #tpu.memory_space<smem>>) -> (i32, i32) {
    %c0_i32 = arith.constant 0 : i32
    %c0_i32_0 = arith.constant 0 : i32
    %c0_i32_1 = arith.constant 0 : i32
    return %c0_i32, %c0_i32_0 : i32, i32
  }
  func.func @transform_1(%arg0: i32, %arg1: memref<16xi32, #tpu.memory_space<smem>>) -> (i32, i32) {
    %c0_i32 = arith.constant 0 : i32
    %c0_i32_0 = arith.constant 0 : i32
    return %arg0, %c0_i32 : i32, i32
  }
}

</mosaic_0001>

<bundles_post_ra>
// kernel: tpu_custom_call.1
= control target key start
LH: loop header
LB: loop body
LE: loop exit
PB: predicated region body
PF: predicated region fallthrough
CT: control target
= control target key end

     0   :  { %s266_s9 = smov [#allocation3]   ;;  %s336_s0 = inlined_call_operand.hbm [shape: s32[16], index: 0, kind: input, shape index: {}]   ;;  %s337_s1 = inlined_call_operand.hbm [shape: f32[256,128], index: 1, kind: input, shape index: {}]   ;;  %s338_s2 = inlined_call_operand.hbm [shape: f32[16,128], index: 2, kind: output, shape index: {}]  }
   0x1   :  { %8 = dma.hbm_to_smem %s336_s0, 16, %s266_s9, [#allocation2] }
   0x2   :  { %260 = dma.done.wait [#allocation2], 16 }
   0x3   :  { %261 = vsyncadd [#allocation2], 4294967280 }
   0x4   :  { %10 = sfence }
   0x5   :  { %11 = vsyncpa [#allocation5], 0 }
   0x6   :  { %12 = vsyncpa [#allocation6], 0  ;;  %s267_s12 = smov [#allocation4]  }
   0x7   :  { %s18_s13 = sshll.u32 %s267_s12, 4  ;;  %s19_s13 = int_to_ptr.vmem [resolvable:$true] %s18_s13 }
   0x8   :  { %s228_s14 = scalar_lea.vmem %s19_s13, 4096  ;;  %p233_p1 = scmp.lt.s32.totalorder %s19_s13, %s19_s13 }
   0x9   :  { %p229_p0 = scmp.ne.s32.totalorder %s19_s13, %s228_s14  ;;  %p234_p2 = scmp.lt.s32.totalorder %s228_s14, %s228_s14 }
   0xb   :  { %p235_p3 = por %p234_p2, %p233_p1 }
   0xd   :  { %p236_p4 = pnand %p235_p3, %p229_p0 }
   0xf   :  { %239 = shalt.err (!%p236_p4)
}
  0x10   :  { %s268_s15 = smov 128   ;;  %s269_s16 = smov 8  }
  0x11   :  { %24 = dma.hbm_to_vmem [thread:$0]  %s337_s1, 4096, %s19_s13, [#allocation5], %s268_s15, %s268_s15, %s269_s16  }
  0x12   :  { %262 = dma.done.wait [#allocation5], 4096  }
  0x13   :  { %263 = vsyncadd [#allocation5], 4294963200  ;;  %s29_s18 = sld [smem:[#allocation3]]  ;;  %vm134_vm0 = vcmask 1040384   ;;  %vm136_vm1 = vcmask 1041408   ;;  %vm138_vm2 = vcmask 1042432  }
  0x14   :  { %s192_s19 = sld [smem:[#allocation3 + $0x1]]  ;;  %vm140_vm3 = vcmask 1043456   ;;  %vm142_vm4 = vcmask 1044480   ;;  %vm144_vm5 = vcmask 1045504   ;;  %vm146_vm6 = vcmask 1046528  }
  0x15   :  { %s193_s20 = sld [smem:[#allocation3 + $0x2]] }
  0x16   :  { %s194_s21 = sld [smem:[#allocation3 + $0x3]] }
  0x17   :  { %s195_s22 = sld [smem:[#allocation3 + $0x4]] }
  0x18   :  { %s295_s23 = sld [smem:[#allocation3 + $0x5]] }
  0x19   :  { %s297_s24 = sld [smem:[#allocation3 + $0x6]]  ;;  %s30_s25 = scalar_lea.vmem [#allocation4], %s29_s18 }
  0x1a   :  { %v31_v0 = vld [vmem:[%s30_s25] sm:$0x1]  ;;  %s299_s26 = sld [smem:[#allocation3 + $0x7]]  ;;  %s34_s1 = scalar_lea.vmem [#allocation4], %s192_s19 }
  0x1b   :  { %v35_v1 = vld [vmem:[%s34_s1] sm:$0x1]  ;;  %s301_s27 = sld [smem:[#allocation3 + $0x8]]  ;;  %s38_s28 = scalar_lea.vmem [#allocation4], %s193_s20 }
  0x1c   :  { %v39_v2 = vld [vmem:[%s38_s28] sm:$0x1]  ;;  %v93_v3 = vrot.slane %v35_v1, 7  ;;  %s303_s29 = sld [smem:[#allocation3 + $0x9]]  ;;  %s42_s30 = scalar_lea.vmem [#allocation4], %s194_s21 }
  0x1d   :  { %v43_v4 = vld [vmem:[%s42_s30] sm:$0x1]  ;;  %v96_v5 = vrot.slane %v39_v2, 6  ;;  %s305_s3 = sld [smem:[#allocation3 + $0xa]]  ;;  %s46_s4 = scalar_lea.vmem [#allocation4], %s195_s22 }
  0x1e   :  { %v47_v6 = vld [vmem:[%s46_s4] sm:$0x1]  ;;  %v99_v7 = vrot.slane %v43_v4, 5  ;;  %v135_v8 = vsel %vm134_vm0, %v31_v0, %v93_v3  ;;  %s308_s5 = sld [smem:[#allocation3 + $0xb]]  ;;  %s50_s6 = scalar_lea.vmem [#allocation4], %s295_s23 }
  0x1f   :  { %v51_v9 = vld [vmem:[%s50_s6] sm:$0x1]  ;;  %v102_v10 = vrot.slane %v47_v6, 4  ;;  %v137_v11 = vsel %vm136_vm1, %v135_v8, %v96_v5  ;;  %s203_s7 = sld [smem:[#allocation3 + $0xc]]  ;;  %s54_s8 = scalar_lea.vmem [#allocation4], %s297_s24 }
  0x20   :  { %v55_v12 = vld [vmem:[%s54_s8] sm:$0x1]  ;;  %v105_v13 = vrot.slane %v51_v9, 3  ;;  %v139_v14 = vsel %vm138_vm2, %v137_v11, %v99_v7  ;;  %s204_s9 = sld [smem:[#allocation3 + $0xd]]  ;;  %s58_s10 = scalar_lea.vmem [#allocation4], %s299_s26 }
  0x21   :  { %v59_v15 = vld [vmem:[%s58_s10] sm:$0x1]  ;;  %v108_v16 = vrot.slane %v55_v12, 2  ;;  %v141_v17 = vsel %vm140_vm3, %v139_v14, %v102_v10  ;;  %s205_s11 = sld [smem:[#allocation3 + $0xe]]  ;;  %s62_s13 = scalar_lea.vmem [#allocation4], %s301_s27 }
  0x22   :  { %v111_v18 = vrot.slane %v59_v15, 1  ;;  %v143_v19 = vsel %vm142_vm4, %v141_v17, %v105_v13  ;;  %s206_s12 = sld [smem:[#allocation3 + $0xf]]  ;;  %v63_v21 = vld [vmem:[%s62_s13] sm:$0x1]  ;;  %s66_s14 = scalar_lea.vmem [#allocation4], %s303_s29 }
  0x23   :  { %v145_v20 = vsel %vm144_vm5, %v143_v19, %v108_v16  ;;  %v67_v22 = vld [vmem:[%s66_s14] sm:$0x1]  ;;  %s70_s0 = scalar_lea.vmem [#allocation4], %s305_s3  ;;  %s270_s22 = smov [#allocation7]  }
  0x24   :  { %v147_v23 = vsel %vm146_vm6, %v145_v20, %v111_v18  ;;  %v71_v24 = vld [vmem:[%s70_s0] sm:$0x1]  ;;  %v114_v25 = vrot.slane %v67_v22, 7  ;;  %s74_s17 = scalar_lea.vmem [#allocation4], %s308_s5  ;;  %s164_s23 = sshll.u32 %s270_s22, 4  ;;  %s165_s23 = int_to_ptr.vmem [resolvable:$true] %s164_s23 }
  0x25   :  { %v155_v26 = vmul.f32 11.313708, %v147_v23  ;;  %v75_v27 = vld [vmem:[%s74_s17] sm:$0x1]  ;;  %v117_v28 = vrot.slane %v71_v24, 6  ;;  %s78_s18 = scalar_lea.vmem [#allocation4], %s203_s7  ;;  %p245_p6 = scmp.lt.s32.totalorder %s165_s23, %s165_s23 }
  0x26   :  { %v79_v29 = vld [vmem:[%s78_s18] sm:$0x1]  ;;  %v120_v30 = vrot.slane %v75_v27, 5  ;;  %v148_v31 = vsel %vm134_vm0, %v63_v21, %v114_v25  ;;  %s82_s19 = scalar_lea.vmem [#allocation4], %s204_s9  ;;  %s240_s24 = scalar_lea.vmem %s165_s23, 256 }
  0x27   :  { %157 = vst [vmem:[#allocation7] sm:$0xff] %v155_v26  ;;  %v83_v32 = vld [vmem:[%s82_s19] sm:$0x1]  ;;  %v123_v33 = vrot.slane %v79_v29, 4  ;;  %v149_v34 = vsel %vm136_vm1, %v148_v31, %v117_v28  ;;  %s86_s20 = scalar_lea.vmem [#allocation4], %s205_s11  ;;  %p241_p5 = scmp.ne.s32.totalorder %s165_s23, %s240_s24 }
  0x28   :  { %v87_v35 = vld [vmem:[%s86_s20] sm:$0x1]  ;;  %v126_v36 = vrot.slane %v83_v32, 3  ;;  %v150_v37 = vsel %vm138_vm2, %v149_v34, %v120_v30  ;;  %s90_s21 = scalar_lea.vmem [#allocation4], %s206_s12  ;;  %p246_p7 = scmp.lt.s32.totalorder %s240_s24, %s240_s24 }
  0x29   :  { %v91_v38 = vld [vmem:[%s90_s21] sm:$0x1]  ;;  %v129_v39 = vrot.slane %v87_v35, 2  ;;  %v151_v40 = vsel %vm140_vm3, %v150_v37, %v123_v33 }
  0x2a   :  { %v132_v41 = vrot.slane %v91_v38, 1  ;;  %v152_v42 = vsel %vm142_vm4, %v151_v40, %v126_v36  ;;  %p247_p8 = por %p246_p7, %p245_p6 }
  0x2b   :  { %v153_v43 = vsel %vm144_vm5, %v152_v42, %v129_v39 }
  0x2c   :  { %v154_v44 = vsel %vm146_vm6, %v153_v43, %v132_v41  ;;  %p248_p9 = pnand %p247_p8, %p241_p5 }
  0x2d   :  { %v156_v45 = vmul.f32 11.313708, %v154_v44 }
  0x2f   :  { %158 = vst [vmem:[#allocation7 + $0x8] sm:$0xff] %v156_v45 }
  0x30   :  { %251 = shalt.err (!%p248_p9)
}
  0x31   :  { %170 = dma.vmem_to_hbm [thread:$0]  %s165_s23, 256, %s338_s2, [#allocation6], %s268_s15, %s268_s15, %s269_s16  }
  0x32   :  { %264 = dma.done.wait [#allocation6], 256  }
  0x33   :  { %265 = vsyncadd [#allocation6], 4294967040 }
  0x34   :  { %174 = vsyncpa [#allocation5], 1 }
  0x35   :  { %175 = vsyncpa [#allocation6], 1 }

</bundles_post_ra>
